<compile_context>
chip_gen: v7x
topology: tpu7x:2x2x1
jax: 0.10.0
libtpu: 0.0.40
codegen_flags: <defaults>
</compile_context>

<pallas_src>
import functools

import jax
import jax.numpy as jnp
import numpy as np
from jax.experimental import pallas as pl
from jax.experimental.pallas import tpu as pltpu


def _round_up(x, m):
    return ((x + m - 1) // m) * m


def _supcon_kernel(anchor_ref, contrast_ref, a_lab_ref, c_lab_ref, out_ref, *,
                   inv_temp, loss_scale, n_rows, n_cols, tm, m_pad, n_pad):
    i = pl.program_id(0)

    # Anchor tile with 1/temperature folded in: a (TM, D) VPU pass instead of
    # scaling the (TM, M) logits.
    a = anchor_ref[...]
    a = a * jnp.asarray(inv_temp, dtype=a.dtype)
    c = contrast_ref[...]                                   # (M_pad, D) resident

    # logits[r, j] = <a_r, c_j>: contract the last (lane) dim of both operands
    # directly on the MXU (no explicit transpose of `c`).
    logits = jax.lax.dot_general(
        a, c, dimension_numbers=(((1,), (1,)), ((), ())),
        preferred_element_type=jnp.float32)                 # (TM, M_pad) f32

    # In-kernel masks (no HBM mask traffic).
    row_ids = jax.lax.broadcasted_iota(jnp.int32, (tm, m_pad), 0) + i * tm
    col_ids = jax.lax.broadcasted_iota(jnp.int32, (tm, m_pad), 1)
    not_self = row_ids != col_ids                           # logits_mask

    if n_cols < m_pad:                                      # padded columns exist
        valid_col = col_ids < n_cols
        row_max = jnp.max(jnp.where(valid_col, logits, -jnp.inf),
                          axis=1, keepdims=True)
        lmask = jnp.logical_and(not_self, valid_col)
    else:
        row_max = jnp.max(logits, axis=1, keepdims=True)
        lmask = not_self
    shifted = logits - row_max

    # Softmax denominator excluding self-contrast (and padded columns).
    exp_l = jnp.where(lmask, jnp.exp(shifted), 0.0)
    denom = jnp.sum(exp_l, axis=1, keepdims=True)           # (TM, 1)
    log_denom = jnp.log(denom)                              # EUP

    # Positives mask from label equality (rebuilt in-kernel).
    pos = jnp.logical_and(a_lab_ref[...] == c_lab_ref[...], lmask)
    if n_rows < n_pad:                                      # padded anchor rows
        pos = jnp.logical_and(pos, row_ids < n_rows)
    pos_f = pos.astype(jnp.float32)

    # sum(mask * log_prob) == sum(mask * shifted) - log(denom) * sum(mask)
    sum_mask = jnp.sum(pos_f, axis=1, keepdims=True)              # (TM, 1)
    sum_mask_logits = jnp.sum(pos_f * shifted, axis=1, keepdims=True)
    mask_pos_pairs = jnp.where(sum_mask < 1e-6, 1.0, sum_mask)
    # Exact divide: (TM, 1) vector only, keeps the tight reference tolerance.
    mean_log_prob_pos = (sum_mask_logits - log_denom * sum_mask) / mask_pos_pairs

    out_ref[...] = (-loss_scale) * mean_log_prob_pos              # per-row loss


def supcon_loss(features, labels=None, mask=None, *, temperature=0.07,
                contrast_mode='all', base_temperature=0.07,
                matmul_dtype=jnp.float32, block_rows=256):
    """JAX/Pallas equivalent of SupConLoss.forward (labels / SimCLR paths)."""
    if features.ndim < 3:
        raise ValueError('`features` needs to be [bsz, n_views, ...]')
    if features.ndim > 3:
        features = features.reshape(features.shape[0], features.shape[1], -1)
    bsz, n_views, d = features.shape

    if labels is not None and mask is not None:
        raise ValueError('Cannot define both `labels` and `mask`')
    if mask is not None:
        # TODO(synk): explicit (possibly asymmetric) bsz x bsz `mask` cannot be
        # rebuilt from label equality in-kernel; it would need the tiled N x M
        # mask streamed in (the old bandwidth-bound path) - not implemented.
        raise NotImplementedError('explicit `mask` argument is not supported')
    if labels is None:
        # Identity mask (SimCLR) == label equality with unique pseudo-labels.
        labels_vec = jnp.arange(bsz, dtype=jnp.int32)
    else:
        labels_vec = labels.reshape(-1).astype(jnp.int32)
        if labels_vec.shape[0] != bsz:
            raise ValueError('Num of labels does not match num of features')

    contrast_count = n_views
    # torch.cat(torch.unbind(features, dim=1), dim=0) -> [n_views*bsz, D]
    contrast_feature = jnp.transpose(features, (1, 0, 2)).reshape(n_views * bsz, d)
    contrast_labels = jnp.tile(labels_vec, contrast_count)

    if contrast_mode == 'one':
        anchor_feature = features[:, 0]
        anchor_labels = labels_vec
        anchor_count = 1
    elif contrast_mode == 'all':
        anchor_feature = contrast_feature
        anchor_labels = contrast_labels
        anchor_count = contrast_count
    else:
        raise ValueError('Unknown mode: {}'.format(contrast_mode))

    n_rows = anchor_count * bsz     # anchors
    n_cols = contrast_count * bsz   # contrasts

    # ---- padding & tiling (lane axis D -> x128, M -> x128, N -> x row tile;
    # padded rows/columns are masked out inside the kernel). ----
    if block_rows % 8 != 0:
        raise ValueError('block_rows must be a multiple of 8')
    d_pad = _round_up(d, 128)
    m_pad = _round_up(n_cols, 128)
    tm = _round_up(n_rows, 8) if n_rows <= block_rows else block_rows
    n_pad = _round_up(n_rows, tm)
    num_tiles = n_pad // tm

    anchor = jnp.zeros((n_pad, d_pad), matmul_dtype).at[:n_rows, :d].set(
        anchor_feature.astype(matmul_dtype))
    contrast = jnp.zeros((m_pad, d_pad), matmul_dtype).at[:n_cols, :d].set(
        contrast_feature.astype(matmul_dtype))
    a_lab = jnp.full((n_pad, 1), -1, jnp.int32).at[:n_rows, 0].set(anchor_labels)
    c_lab = jnp.full((1, m_pad), -2, jnp.int32).at[0, :n_cols].set(contrast_labels)

    kernel = functools.partial(
        _supcon_kernel,
        inv_temp=1.0 / float(temperature),
        loss_scale=float(temperature) / float(base_temperature),
        n_rows=n_rows, n_cols=n_cols, tm=tm, m_pad=m_pad, n_pad=n_pad)

    per_row = pl.pallas_call(
        kernel,
        out_shape=jax.ShapeDtypeStruct((n_pad, 1), jnp.float32),
        grid=(num_tiles,),
        in_specs=[
            pl.BlockSpec((tm, d_pad), lambda i: (i, 0)),     # anchor row tile
            pl.BlockSpec((m_pad, d_pad), lambda i: (0, 0)),  # contrast (resident)
            pl.BlockSpec((tm, 1), lambda i: (i, 0)),         # anchor labels
            pl.BlockSpec((1, m_pad), lambda i: (0, 0)),      # contrast labels
        ],
        out_specs=pl.BlockSpec((tm, 1), lambda i: (i, 0)),
        compiler_params=pltpu.CompilerParams(
            dimension_semantics=("parallel",)),
    )(anchor, contrast, a_lab, c_lab)

    # Padded anchor rows contribute exactly 0; mean over the true row count.
    return jnp.sum(per_row[:n_rows, 0]) / n_rows


def _reference_supcon(features, labels, temperature=0.07, base_temperature=0.07):
    """Pure-JAX reference mirroring the PyTorch module (contrast_mode='all')."""
    bsz, n_views, d = features.shape
    labels = labels.reshape(-1, 1)
    mask = jnp.equal(labels, labels.T).astype(jnp.float32)
    contrast_feature = jnp.concatenate(
        [features[:, v] for v in range(n_views)], axis=0)
    anchor_feature = contrast_feature
    anchor_count = contrast_count = n_views
    logits = jnp.matmul(anchor_feature, contrast_feature.T) / temperature
    logits = logits - jnp.max(logits, axis=1, keepdims=True)
    mask = jnp.tile(mask, (anchor_count, contrast_count))
    n = anchor_count * bsz
    logits_mask = 1.0 - jnp.eye(n, dtype=jnp.float32)
    mask = mask * logits_mask
    exp_logits = jnp.exp(logits) * logits_mask
    log_prob = logits - jnp.log(jnp.sum(exp_logits, axis=1, keepdims=True))
    mask_pos_pairs = jnp.sum(mask, axis=1)
    mask_pos_pairs = jnp.where(mask_pos_pairs < 1e-6, 1.0, mask_pos_pairs)
    mean_log_prob_pos = jnp.sum(mask * log_prob, axis=1) / mask_pos_pairs
    loss = -(temperature / base_temperature) * mean_log_prob_pos
    return jnp.mean(loss.reshape(anchor_count, bsz))


if __name__ == "__main__":
    key = jax.random.PRNGKey(0)
    k1, k2, k3, k4 = jax.random.split(key, 4)

    # --- small config consistent with the module ([bsz, n_views, feat_dim]) ---
    bsz, n_views, feat_dim = 4, 2, 32
    feats = jax.random.normal(k1, (bsz, n_views, feat_dim), dtype=jnp.float32)
    feats = feats / jnp.linalg.norm(feats, axis=-1, keepdims=True)
    labels = jax.random.randint(k2, (bsz,), 0, 2)

    loss = jax.block_until_ready(
        supcon_loss(feats, labels=labels, temperature=0.07,
                    contrast_mode='all', base_temperature=0.07))
    ref = _reference_supcon(feats, labels)
    np.testing.assert_allclose(np.asarray(loss), np.asarray(ref),
                               rtol=1e-5, atol=1e-5)

    # SimCLR path (labels=None -> identity mask via unique pseudo-labels).
    loss_simclr = jax.block_until_ready(supcon_loss(feats, labels=None))
    ref_simclr = _reference_supcon(feats, jnp.arange(bsz))
    np.testing.assert_allclose(np.asarray(loss_simclr), np.asarray(ref_simclr),
                               rtol=1e-5, atol=1e-5)

    # Multi-tile config exercising the row grid (2 tiles of 128 rows) and the
    # D / M / N padding + in-kernel masking paths.
    bsz2, n_views2, feat_dim2 = 70, 2, 40
    feats2 = jax.random.normal(k3, (bsz2, n_views2, feat_dim2), dtype=jnp.float32)
    feats2 = feats2 / jnp.linalg.norm(feats2, axis=-1, keepdims=True)
    labels2 = jax.random.randint(k4, (bsz2,), 0, 5)
    loss2 = jax.block_until_ready(
        supcon_loss(feats2, labels=labels2, block_rows=128))
    ref2 = _reference_supcon(feats2, labels2)
    np.testing.assert_allclose(np.asarray(loss2), np.asarray(ref2),
                               rtol=1e-5, atol=1e-5)

    # bf16 MXU path (f32 accumulation) - lower precision, looser check.
    loss_bf16 = jax.block_until_ready(
        supcon_loss(feats2, labels=labels2, block_rows=128,
                    matmul_dtype=jnp.bfloat16))
    np.testing.assert_allclose(np.asarray(loss_bf16), np.asarray(ref2),
                               rtol=1e-1, atol=1e-1)

    print("KERNEL_OK")
</pallas_src>

<mosaic_0001>
module attributes {stable_mosaic.version = 11 : i64} {
  func.func @_supcon_kernel(%arg0: i32, %arg1: memref<8x128xf32, #tpu.memory_space<vmem>>, %arg2: memref<128x128xf32, #tpu.memory_space<vmem>>, %arg3: memref<8x1xi32, #tpu.memory_space<vmem>>, %arg4: memref<1x128xi32, #tpu.memory_space<vmem>>, %arg5: memref<8x1xf32, #tpu.memory_space<vmem>>) attributes {dimension_semantics = [#tpu.dimension_semantics<parallel>], iteration_bounds = array<i64: 1>, scalar_prefetch = 0 : i64, scratch_operands = 0 : i64, tpu.core_type = #tpu.core_type<tc>, window_params = [{transform_indices = @transform_0, window_bounds = array<i64: 8, 128>}, {pipeline_mode = #tpu.pipeline_mode<synchronous>, transform_indices = @transform_1, window_bounds = array<i64: 128, 128>}, {transform_indices = @transform_2, window_bounds = array<i64: 8, 1>}, {pipeline_mode = #tpu.pipeline_mode<synchronous>, transform_indices = @transform_3, window_bounds = array<i64: 1, 128>}, {transform_indices = @transform_4, window_bounds = array<i64: 8, 1>}]} {
    %c0 = arith.constant 0 : index
    %c0_0 = arith.constant 0 : index
    %0 = vector.load %arg1[%c0, %c0_0] : memref<8x128xf32, #tpu.memory_space<vmem>>, vector<8x128xf32>
    %cst = arith.constant 14.2857141 : f32
    %1 = vector.broadcast %cst : f32 to vector<8x128xf32>
    %2 = arith.mulf %0, %1 : vector<8x128xf32>
    %c0_1 = arith.constant 0 : index
    %c0_2 = arith.constant 0 : index
    %3 = vector.load %arg2[%c0_1, %c0_2] : memref<128x128xf32, #tpu.memory_space<vmem>>, vector<128x128xf32>
    %cst_3 = arith.constant dense<0.000000e+00> : vector<8x128xf32>
    %4 = tpu.matmul %2, %3, %cst_3 {dimension_numbers = #tpu.dot_dimension_numbers<[1], [1], [0], [0], [0, 0, 1, 0], [], []>} : vector<8x128xf32>, vector<128x128xf32>, vector<8x128xf32> -> vector<8x128xf32>
    %5 = tpu.iota {dimensions = array<i32: 0>} : vector<8x128xi32>
    %c8_i32 = arith.constant 8 : i32
    %6 = arith.muli %arg0, %c8_i32 : i32
    %7 = vector.broadcast %6 : i32 to vector<8x128xi32>
    %8 = arith.addi %5, %7 : vector<8x128xi32>
    %9 = tpu.iota {dimensions = array<i32: 1>} : vector<8x128xi32>
    %10 = arith.cmpi ne, %8, %9 : vector<8x128xi32>
    %c8_i32_4 = arith.constant 8 : i32
    %11 = vector.broadcast %c8_i32_4 : i32 to vector<8x128xi32>
    %12 = arith.cmpi slt, %9, %11 : vector<8x128xi32>
    %cst_5 = arith.constant 0xFF800000 : f32
    %13 = vector.broadcast %cst_5 : f32 to vector<8x128xf32>
    %14 = arith.select %12, %4, %13 : vector<8x128xi1>, vector<8x128xf32>
    %cst_6 = arith.constant dense<0xFF800000> : vector<8xf32>
    %15 = vector.multi_reduction <maximumf>, %14, %cst_6 [1] : vector<8x128xf32> to vector<8xf32>
    %16 = vector.shape_cast %15 : vector<8xf32> to vector<8x1xf32>
    %17 = arith.andi %10, %12 : vector<8x128xi1>
    %18 = vector.broadcast %16 : vector<8x1xf32> to vector<8x128xf32>
    %19 = arith.subf %4, %18 : vector<8x128xf32>
    %20 = math.exp %19 : vector<8x128xf32>
    %cst_7 = arith.constant 0.000000e+00 : f32
    %21 = vector.broadcast %cst_7 : f32 to vector<8x128xf32>
    %22 = arith.select %17, %20, %21 : vector<8x128xi1>, vector<8x128xf32>
    %cst_8 = arith.constant dense<0.000000e+00> : vector<8xf32>
    %23 = vector.multi_reduction <add>, %22, %cst_8 [1] : vector<8x128xf32> to vector<8xf32>
    %24 = vector.shape_cast %23 : vector<8xf32> to vector<8x1xf32>
    %25 = math.log %24 : vector<8x1xf32>
    %c0_9 = arith.constant 0 : index
    %c0_10 = arith.constant 0 : index
    %26 = vector.load %arg3[%c0_9, %c0_10] : memref<8x1xi32, #tpu.memory_space<vmem>>, vector<8x1xi32>
    %c0_11 = arith.constant 0 : index
    %c0_12 = arith.constant 0 : index
    %27 = vector.load %arg4[%c0_11, %c0_12] : memref<1x128xi32, #tpu.memory_space<vmem>>, vector<1x128xi32>
    %28 = vector.broadcast %26 : vector<8x1xi32> to vector<8x128xi32>
    %29 = vector.broadcast %27 : vector<1x128xi32> to vector<8x128xi32>
    %30 = arith.cmpi eq, %28, %29 : vector<8x128xi32>
    %31 = arith.andi %30, %17 : vector<8x128xi1>
    %32 = arith.extui %31 : vector<8x128xi1> to vector<8x128xi32>
    %33 = arith.sitofp %32 : vector<8x128xi32> to vector<8x128xf32>
    %cst_13 = arith.constant dense<0.000000e+00> : vector<8xf32>
    %34 = vector.multi_reduction <add>, %33, %cst_13 [1] : vector<8x128xf32> to vector<8xf32>
    %35 = vector.shape_cast %34 : vector<8xf32> to vector<8x1xf32>
    %36 = arith.mulf %33, %19 : vector<8x128xf32>
    %cst_14 = arith.constant dense<0.000000e+00> : vector<8xf32>
    %37 = vector.multi_reduction <add>, %36, %cst_14 [1] : vector<8x128xf32> to vector<8xf32>
    %38 = vector.shape_cast %37 : vector<8xf32> to vector<8x1xf32>
    %cst_15 = arith.constant 9.99999997E-7 : f32
    %39 = vector.broadcast %cst_15 : f32 to vector<8x1xf32>
    %40 = arith.cmpf olt, %35, %39 : vector<8x1xf32>
    %cst_16 = arith.constant 1.000000e+00 : f32
    %41 = vector.broadcast %cst_16 : f32 to vector<8x1xf32>
    %42 = arith.select %40, %41, %35 : vector<8x1xi1>, vector<8x1xf32>
    %43 = arith.mulf %25, %35 : vector<8x1xf32>
    %44 = arith.subf %38, %43 : vector<8x1xf32>
    %45 = arith.divf %44, %42 : vector<8x1xf32>
    %cst_17 = arith.constant -1.000000e+00 : f32
    %46 = vector.broadcast %cst_17 : f32 to vector<8x1xf32>
    %47 = arith.mulf %46, %45 : vector<8x1xf32>
    %c0_18 = arith.constant 0 : index
    %c0_19 = arith.constant 0 : index
    %48 = vector.load %arg5[%c0_18, %c0_19] : memref<8x1xf32, #tpu.memory_space<vmem>>, vector<8x1xf32>
    tpu.vector_store %arg5[%c0_18, %c0_19], %47 {strides = array<i32>} : memref<8x1xf32, #tpu.memory_space<vmem>>, vector<8x1xf32>,
    return
  }
  func.func @transform_0(%arg0: i32) -> (i32, i32) {
    %c0_i32 = arith.constant 0 : i32
    %c0_i32_0 = arith.constant 0 : i32
    return %arg0, %c0_i32 : i32, i32
  }
  func.func @transform_1(%arg0: i32) -> (i32, i32) {
    %c0_i32 = arith.constant 0 : i32
    %c0_i32_0 = arith.constant 0 : i32
    %c0_i32_1 = arith.constant 0 : i32
    return %c0_i32, %c0_i32_0 : i32, i32
  }
  func.func @transform_2(%arg0: i32) -> (i32, i32) {
    %c0_i32 = arith.constant 0 : i32
    %c0_i32_0 = arith.constant 0 : i32
    return %arg0, %c0_i32 : i32, i32
  }
  func.func @transform_3(%arg0: i32) -> (i32, i32) {
    %c0_i32 = arith.constant 0 : i32
    %c0_i32_0 = arith.constant 0 : i32
    %c0_i32_1 = arith.constant 0 : i32
    return %c0_i32, %c0_i32_0 : i32, i32
  }
  func.func @transform_4(%arg0: i32) -> (i32, i32) {
    %c0_i32 = arith.constant 0 : i32
    %c0_i32_0 = arith.constant 0 : i32
    return %arg0, %c0_i32 : i32, i32
  }
}

</mosaic_0001>

<bundles_post_ra>
// kernel: tpu_custom_call.1
= control target key start
LH: loop header
LB: loop body
LE: loop exit
PB: predicated region body
PF: predicated region fallthrough
CT: control target
= control target key end

     0   :  { %9 = vsyncpa [#allocation3], 0  ;;  %s288_s15 = smov [#allocation2]   ;;  %s346_s0 = inlined_call_operand.vmem [shape: f32[8,128], index: 0, kind: input, shape index: {}]   ;;  %s347_s1 = inlined_call_operand.hbm [shape: f32[128,128], index: 1, kind: input, shape index: {}]   ;;  %s348_s2 = inlined_call_operand.vmem [shape: s32[8,1], index: 2, kind: input, shape index: {}]   ;;  %s349_s3 = inlined_call_operand.vmem [shape: s32[1,128], index: 3, kind: input, shape index: {}]   ;;  %s350_s4 = inlined_call_operand.vmem [shape: f32[8,1], index: 4, kind: output, shape index: {}]  }
   0x1   :  { %s17_s16 = sshll.u32 %s288_s15, 4  ;;  %s264_s19 = scalar_lea.hbm %s347_s1, 2048  ;;  %s18_s16 = int_to_ptr.vmem [resolvable:$true] %s17_s16 }
   0x2   :  { %p265_p0 = scmp.ne.s32.totalorder %s347_s1, %s264_s19  ;;  %p268_p1 = scmp.lt.u32.totalorder %s264_s19, %s347_s1 }
   0x4   :  { %p270_p2 = pnand %p268_p1, %p265_p0 }
   0x6   :  { %273 = shalt.err (!%p270_p2)
}
   0x7   :  { %s274_s24 = scalar_lea.vmem %s18_s16, 2048  ;;  %p279_p4 = scmp.lt.s32.totalorder %s18_s16, %s18_s16 }
   0x8   :  { %p275_p3 = scmp.ne.s32.totalorder %s18_s16, %s274_s24  ;;  %p280_p5 = scmp.lt.s32.totalorder %s274_s24, %s274_s24 }
   0xa   :  { %p281_p6 = por %p280_p5, %p279_p4 }
   0xc   :  { %p282_p7 = pnand %p281_p6, %p275_p3 }
   0xe   :  { %285 = shalt.err (!%p282_p7)
}
   0xf   :  { %s289_s25 = smov 128   ;;  %s290_s26 = smov 8  }
  0x10   :  { %23 = dma.hbm_to_vmem [thread:$0]  %s347_s1, 2048, %s18_s16, [#allocation3], %s289_s25, %s289_s25, %s290_s26  }
  0x11   :  { %286 = dma.done.wait [#allocation3], 2048  }
  0x12   :  { %287 = vsyncadd [#allocation3], 4294965248  ;;  %v291_v0 = vmov 0.0|0.0   ;;  %vm292_vm0 = vmmov 0   ;;  %v293_v1 = vmov 0.0   ;;  %v33_v2 = vld [vmem:[#allocation2] sm:$0xff]  ;;  %v119_v29 = vlaneseq }
  0x13   :  { %226 = vmatprep.subr.bf16.mxu0 %v291_v0  ;;  %223 = vmatprep.mubr.msk.f32.mxu0 %vm292_vm0, %v293_v1  ;;  %v34_v3 = vld [vmem:[#allocation2 + $0x8] sm:$0xff]  ;;  %v35_v5 = vld [vmem:[#allocation2 + $0x10] sm:$0xff]  ;;  %v36_v6 = vld [vmem:[#allocation2 + $0x18] sm:$0xff]  ;;  %v294_v28 = vmov 0   ;;  %vm165_vm7 = vcmask 7168  }
  0x14   :  { %v227_v4 = vpack.c.bf16 %v34_v3, %v33_v2  ;;  %v230_v7 = vpack.c.bf16 %v36_v6, %v35_v5  ;;  %v37_v8 = vld [vmem:[#allocation2 + $0x20] sm:$0xff]  ;;  %v38_v9 = vld [vmem:[#allocation2 + $0x28] sm:$0xff]  ;;  %v39_v11 = vld [vmem:[#allocation2 + $0x30] sm:$0xff]  ;;  %257 = vset.pattern.permute.xlu0 %v294_v28  ;;  %v125_v30 = vand.u32 127, %v119_v29  ;;  %v120_v36 = vshrl.u32 %v119_v29, 7 }
  0x15   :  { %v233_v10 = vpack.c.bf16 %v38_v9, %v37_v8  ;;  %v40_v12 = vld [vmem:[#allocation2 + $0x38] sm:$0xff]  ;;  %v41_v14 = vld [vmem:[#allocation2 + $0x40] sm:$0xff]  ;;  %v42_v15 = vld [vmem:[#allocation2 + $0x48] sm:$0xff] }
  0x16   :  { %228 = vmatpush3.bf16.xpose.msra.mxu0 %v227_v4  ;;  %v236_v13 = vpack.c.bf16 %v40_v12, %v39_v11  ;;  %v239_v16 = vpack.c.bf16 %v42_v15, %v41_v14  ;;  %v43_v17 = vld [vmem:[#allocation2 + $0x50] sm:$0xff]  ;;  %v44_v18 = vld [vmem:[#allocation2 + $0x58] sm:$0xff]  ;;  %v45_v20 = vld [vmem:[#allocation2 + $0x60] sm:$0xff]  ;;  %vm127_vm1 = vcmp.lt.s32.totalorder %v125_v30, 8  ;;  %vm126_vm2 = vcmp.ne.s32.totalorder %v120_v36, %v125_v30 }
  0x17   :  { %229 = vmatprep.subr.bf16.mxu0 %v291_v0  ;;  %v242_v19 = vpack.c.bf16 %v44_v18, %v43_v17  ;;  %v46_v21 = vld [vmem:[#allocation2 + $0x68] sm:$0xff]  ;;  %v47_v23 = vld [vmem:[#allocation2 + $0x70] sm:$0xff]  ;;  %v48_v24 = vld [vmem:[#allocation2 + $0x78] sm:$0xff] }
  0x18   :  { %v245_v22 = vpack.c.bf16 %v46_v21, %v45_v20  ;;  %v248_v25 = vpack.c.bf16 %v48_v24, %v47_v23  ;;  %v31_v26 = vld [vmem:[%s346_s0] sm:$0xff]  ;;  %vm131_vm3 = vmand %vm126_vm2, %vm127_vm1 }
  0x19   :  { %v32_v27 = vmul.f32 14.285714, %v31_v26  ;;  %v140_v34 = vld [vmem:[%s348_s2] sm:$0xff] }
  0x1a   :  { %v172_v39 = vld [vmem:[%s349_s3] ss:$0 sm:$0xff] }
  0x1e   :  { %231 = vmatpush3.bf16.xpose.msra.mxu0 %v230_v7 }
  0x1f   :  { %232 = vmatprep.subr.bf16.mxu0 %v291_v0 }
  0x26   :  { %234 = vmatpush3.bf16.xpose.msra.mxu0 %v233_v10 }
  0x27   :  { %235 = vmatprep.subr.bf16.mxu0 %v291_v0 }
  0x2e   :  { %237 = vmatpush3.bf16.xpose.msra.mxu0 %v236_v13 }
  0x2f   :  { %238 = vmatprep.subr.bf16.mxu0 %v291_v0 }
  0x36   :  { %240 = vmatpush3.bf16.xpose.msra.mxu0 %v239_v16 }
  0x37   :  { %241 = vmatprep.subr.bf16.mxu0 %v291_v0 }
  0x3e   :  { %243 = vmatpush3.bf16.xpose.msra.mxu0 %v242_v19 }
  0x3f   :  { %244 = vmatprep.subr.bf16.mxu0 %v291_v0 }
  0x46   :  { %246 = vmatpush3.bf16.xpose.msra.mxu0 %v245_v22 }
  0x47   :  { %247 = vmatprep.subr.bf16.mxu0 %v291_v0 }
  0x4e   :  { %249 = vmatpush3.bf16.xpose.msra.mxu0 %v248_v25 }
  0x55   :  { %224 = vmatmul.mubr.f32.vlgmr.msra.gmra.mrb[0].mxu0 %v32_v27 }
 0x128   :  { %v115_v31 = vpop.f32.mrb[0].mxu0 }
 0x129   :  { %v225_v32 = vpop.f32.mrb[1].mxu0  ;;  %v128_v33 = vsel %vm127_vm1, %v115_v31, -inf }
 0x12a   :  { %129 = vmax.xlane.f32.xlu0 %v128_v33 }
 0x140   :  { %143 = vperm.xlu0 %257, %v140_v34  }
 0x1b7   :  { %v130_v35 = vpop.xlane.xlu0 %129 }
 0x1b8   :  { %v132_v37 = vsub.f32 %v115_v31, %v130_v35 }
 0x1ba   :  { %v133_v38 = vmul.f32 1.442695, %v132_v37 }
 0x1bc   :  { %258 = vpow2.f32 %v133_v38 }
 0x1bf   :  { %v144_v40 = vpop.permute.xlu0 %143 }
 0x1c0   :  { %vm149_vm4 = vcmp.eq.s32.totalorder %v144_v40, %v172_v39 }
 0x1c1   :  { %vm150_vm5 = vmand %vm149_vm4, %vm131_vm3 }
 0x1c2   :  { %v173_v41 = vsel %vm150_vm5, 1.0, %v293_v1 }
 0x1c3   :  { %v155_v42 = vmul.f32 %v173_v41, %v132_v37 }
 0x1c6   :  { %v259_v43 = vpop.eup %258 }
 0x1c7   :  { %v135_v44 = vsel %vm131_vm3, %v259_v43, 0.0 }
 0x1c8   :  { %136 = vadd.xlane.f32.xlu1 %v135_v44 }
 0x1cc   :  { %153 = vadd.xlane.f32.xlu1 %v173_v41 }
 0x1d0   :  { %156 = vadd.xlane.f32.xlu1 %v155_v42 }
 0x255   :  { %v137_v45 = vpop.xlane.xlu1 %136 }
 0x256   :  { %260 = vlog2.f32 %v137_v45 }
 0x259   :  { %v154_v46 = vpop.xlane.xlu1 %153 }
 0x25a   :  { %vm158_vm6 = vcmp.lt.f32.partialorder %v154_v46, 1e-06 }
 0x25b   :  { %v159_v47 = vsel %vm158_vm6, 1.0, %v154_v46 }
 0x25c   :  { %262 = vrcp.f32 %v159_v47 }
 0x25d   :  { %v157_v51 = vpop.xlane.xlu1 %156 }
 0x260   :  { %v261_v48 = vpop.eup %260 }
 0x261   :  { %v139_v49 = vmul.f32 0.6931472, %v261_v48 }
 0x263   :  { %v160_v50 = vmul.f32 %v154_v46, %v139_v49 }
 0x265   :  { %v161_v52 = vsub.f32 %v157_v51, %v160_v50 }
 0x266   :  { %v263_v53 = vpop.eup %262 }
 0x267   :  { %v163_v54 = vmul.f32 %v263_v53, %v161_v52 }
 0x269   :  { %v164_v55 = vmul.f32 -1.0, %v163_v54 }
 0x26b   :  { %166 = vst.msk [vmem:[%s350_s4] sm:$0xff] %vm165_vm7, %v164_v55 }
 0x26c   :  { %171 = vsyncpa [#allocation3], 1 }

</bundles_post_ra>
